<compile_context>
chip_gen: v5e
topology: v5e:2x2
jax: 0.10.0
libtpu: 0.0.40
codegen_flags: <defaults>
</compile_context>

<pallas_src>
import math

import jax
import jax.numpy as jnp
from jax import lax
from jax.experimental import pallas as pl
from jax.experimental.pallas import tpu as pltpu


# ---------------------------------------------------------------------------
# Fused MHA kernel factory.
# ---------------------------------------------------------------------------
def _make_mha_kernel(inv_scale, compute_dtype, return_attention):
    cdt = compute_dtype

    def kernel(q_ref, k_ref, v_ref,
               wq_ref, bq_ref, wk_ref, bk_ref, wv_ref, bv_ref,
               wfc_ref, bfc_ref,
               out_ref, *maybe_attn_ref):
        h = pl.program_id(1)

        # Activations for this batch element.  Their block index is constant
        # along the head axis, so Pallas keeps them resident (no re-fetch).
        xq = q_ref[0]                      # (Sq, D) f32
        xk = k_ref[0]                      # (Sk, D) f32
        xv = v_ref[0]                      # (Sk, D) f32

        # Per-head projections:  (S, D) @ (D, d_k) + (1, d_k), f32 accumulate.
        q_h = jnp.dot(xq.astype(cdt), wq_ref[0].astype(cdt),
                      preferred_element_type=jnp.float32) + bq_ref[0]
        k_h = jnp.dot(xk.astype(cdt), wk_ref[0].astype(cdt),
                      preferred_element_type=jnp.float32) + bk_ref[0]
        v_h = jnp.dot(xv.astype(cdt), wv_ref[0].astype(cdt),
                      preferred_element_type=jnp.float32) + bv_ref[0]

        # energy = Q K^T / sqrt(d_k): contract last dims directly (no .T).
        energy = lax.dot_general(
            q_h.astype(cdt), k_h.astype(cdt),
            dimension_numbers=(((1,), (1,)), ((), ())),
            preferred_element_type=jnp.float32) * inv_scale    # (Sq, Sk) f32

        # Softmax in f32; approximate reciprocal runs on the EUP slot.
        m = jnp.max(energy, axis=-1, keepdims=True)
        p = jnp.exp(energy - m)
        attn = p * pl.reciprocal(jnp.sum(p, axis=-1, keepdims=True),
                                 approx=True)                  # (Sq, Sk) f32
        # TODO(synk): training-mode dropout on `attn` would go here.

        if return_attention:
            maybe_attn_ref[0][0, 0] = attn

        # Context for this head, then its contribution to the fc projection:
        #   out += (attn @ V_h) @ W_fc[h*d_k:(h+1)*d_k, :]
        ctx = jnp.dot(attn.astype(cdt), v_h.astype(cdt),
                      preferred_element_type=jnp.float32)      # (Sq, d_k) f32
        partial = jnp.dot(ctx.astype(cdt), wfc_ref[0].astype(cdt),
                          preferred_element_type=jnp.float32)  # (Sq, D)  f32

        @pl.when(h == 0)
        def _init():
            # Initialize the resident accumulator with the fc bias.
            out_ref[0] = jnp.zeros(out_ref.shape[1:], jnp.float32) + bfc_ref[...]

        out_ref[0] += partial

    return kernel


# ---------------------------------------------------------------------------
# Python wrapper: weight re-layout + pallas_call plumbing.
# ---------------------------------------------------------------------------
def multi_head_attention(query, key, value, params, n_heads, *,
                         compute_dtype=jnp.float32, return_attention=True):
    """query: (B, Sq, D); key/value: (B, Sk, D).  Returns (out, attn) or out."""
    B, Sq, D = query.shape
    Sk = key.shape[1]
    assert key.shape == value.shape and key.shape[0] == B and key.shape[2] == D
    assert D % n_heads == 0
    d_k = D // n_heads
    inv_scale = 1.0 / math.sqrt(d_k)

    # One-time weight re-layout (tiny, O(D^2); avoids any activation transpose).
    # Projection weights: (D, D) with columns ordered (head, d_k) -> (H, D, d_k)
    def per_head_w(w):
        return jnp.transpose(w.reshape(D, n_heads, d_k), (1, 0, 2))

    def per_head_b(b):
        return b.reshape(n_heads, 1, d_k)

    wq, bq = per_head_w(params["w_q"]), per_head_b(params["b_q"])
    wk, bk = per_head_w(params["w_k"]), per_head_b(params["b_k"])
    wv, bv = per_head_w(params["w_v"]), per_head_b(params["b_v"])
    # fc weight rows are ordered (head, d_k) -> (H, d_k, D); bias -> (1, D).
    wfc = params["fc_w"].reshape(n_heads, d_k, D)
    bfc = params["fc_b"].reshape(1, D)

    kernel = _make_mha_kernel(inv_scale, compute_dtype, return_attention)

    in_specs = [
        pl.BlockSpec((1, Sq, D), lambda b, h: (b, 0, 0)),    # query
        pl.BlockSpec((1, Sk, D), lambda b, h: (b, 0, 0)),    # key
        pl.BlockSpec((1, Sk, D), lambda b, h: (b, 0, 0)),    # value
        pl.BlockSpec((1, D, d_k), lambda b, h: (h, 0, 0)),   # w_q (per head)
        pl.BlockSpec((1, 1, d_k), lambda b, h: (h, 0, 0)),   # b_q
        pl.BlockSpec((1, D, d_k), lambda b, h: (h, 0, 0)),   # w_k
        pl.BlockSpec((1, 1, d_k), lambda b, h: (h, 0, 0)),   # b_k
        pl.BlockSpec((1, D, d_k), lambda b, h: (h, 0, 0)),   # w_v
        pl.BlockSpec((1, 1, d_k), lambda b, h: (h, 0, 0)),   # b_v
        pl.BlockSpec((1, d_k, D), lambda b, h: (h, 0, 0)),   # fc_w (per head)
        pl.BlockSpec((1, D), lambda b, h: (0, 0)),           # fc_b
    ]
    out_spec_main = pl.BlockSpec((1, Sq, D), lambda b, h: (b, 0, 0))

    if return_attention:
        out_shape = (jax.ShapeDtypeStruct((B, Sq, D), jnp.float32),
                     jax.ShapeDtypeStruct((B, n_heads, Sq, Sk), jnp.float32))
        out_specs = (out_spec_main,
                     pl.BlockSpec((1, 1, Sq, Sk), lambda b, h: (b, h, 0, 0)))
    else:
        out_shape = jax.ShapeDtypeStruct((B, Sq, D), jnp.float32)
        out_specs = out_spec_main

    result = pl.pallas_call(
        kernel,
        out_shape=out_shape,
        grid=(B, n_heads),
        in_specs=in_specs,
        out_specs=out_specs,
        compiler_params=pltpu.CompilerParams(
            # batch axis is embarrassingly parallel (megacore sharding);
            # head axis carries the fc accumulator -> "arbitrary".
            dimension_semantics=("parallel", "arbitrary"),
            vmem_limit_bytes=32 * 1024 * 1024,
        ),
    )(query, key, value, wq, bq, wk, bk, wv, bv, wfc, bfc)

    if return_attention:
        out, attn = result
        return out, attn
    return result


# ---------------------------------------------------------------------------
# Pure-JAX reference (same math as the PyTorch module, eval mode, mask=None).
# ---------------------------------------------------------------------------
def mha_reference(query, key, value, params, n_heads):
    B, Sq, D = query.shape
    d_k = D // n_heads
    hp = jax.lax.Precision.HIGHEST

    def proj(x, w, b):
        return jnp.dot(x, w, precision=hp) + b

    q = proj(query, params["w_q"], params["b_q"]).reshape(B, -1, n_heads, d_k)
    k = proj(key, params["w_k"], params["b_k"]).reshape(B, -1, n_heads, d_k)
    v = proj(value, params["w_v"], params["b_v"]).reshape(B, -1, n_heads, d_k)
    q, k, v = (t.transpose(0, 2, 1, 3) for t in (q, k, v))
    energy = jnp.einsum("bhqd,bhkd->bhqk", q, k, precision=hp) / math.sqrt(d_k)
    attn = jax.nn.softmax(energy, axis=-1)
    x = jnp.einsum("bhqk,bhkd->bhqd", attn, v, precision=hp)
    x = x.transpose(0, 2, 1, 3).reshape(B, -1, D)
    out = jnp.dot(x, params["fc_w"], precision=hp) + params["fc_b"]
    return out, attn


def init_params(key, d_model):
    ks = jax.random.split(key, 8)
    scale = 1.0 / math.sqrt(d_model)

    def w(k):
        return jax.random.uniform(k, (d_model, d_model), jnp.float32, -scale, scale)

    def b(k):
        return jax.random.uniform(k, (d_model,), jnp.float32, -scale, scale)

    return {
        "w_q": w(ks[0]), "b_q": b(ks[1]),
        "w_k": w(ks[2]), "b_k": b(ks[3]),
        "w_v": w(ks[4]), "b_v": b(ks[5]),
        "fc_w": w(ks[6]), "fc_b": b(ks[7]),
    }


if __name__ == "__main__":
    B, S, D, H = 2, 8, 32, 4
    root = jax.random.PRNGKey(0)
    k_param, k_q, k_k, k_v = jax.random.split(root, 4)

    params = init_params(k_param, D)
    query = jax.random.normal(k_q, (B, S, D), jnp.float32)
    key_in = jax.random.normal(k_k, (B, S, D), jnp.float32)
    value = jax.random.normal(k_v, (B, S, D), jnp.float32)

    # --- 1) General (cross-attention-style) path, f32 compute, attn returned.
    out, attn = multi_head_attention(query, key_in, value, params, H)
    jax.block_until_ready((out, attn))

    ref_out, ref_attn = mha_reference(query, key_in, value, params, H)
    assert out.shape == (B, S, D)
    assert attn.shape == (B, H, S, S)
    assert bool(jnp.allclose(jnp.sum(attn, axis=-1), 1.0, atol=1e-2))
    assert bool(jnp.allclose(out, ref_out, atol=5e-2, rtol=5e-2))
    assert bool(jnp.allclose(attn, ref_attn, atol=5e-2, rtol=5e-2))

    # --- 2) Self-attention path, bf16 MXU operands, attention weights never
    #         written to HBM (context-only mode).
    out2 = multi_head_attention(query, query, query, params, H,
                                compute_dtype=jnp.bfloat16,
                                return_attention=False)
    jax.block_until_ready(out2)
    ref_out2, _ = mha_reference(query, query, query, params, H)
    assert out2.shape == (B, S, D)
    assert bool(jnp.allclose(out2, ref_out2, atol=1e-1, rtol=1e-1))

    print("KERNEL_OK")
</pallas_src>

<mosaic_0001>
module attributes {stable_mosaic.version = 11 : i64} {
  func.func @kernel(%arg0: i32, %arg1: i32, %arg2: memref<1x8x32xf32, #tpu.memory_space<vmem>>, %arg3: memref<1x8x32xf32, #tpu.memory_space<vmem>>, %arg4: memref<1x8x32xf32, #tpu.memory_space<vmem>>, %arg5: memref<1x32x8xf32, #tpu.memory_space<vmem>>, %arg6: memref<1x1x8xf32, #tpu.memory_space<vmem>>, %arg7: memref<1x32x8xf32, #tpu.memory_space<vmem>>, %arg8: memref<1x1x8xf32, #tpu.memory_space<vmem>>, %arg9: memref<1x32x8xf32, #tpu.memory_space<vmem>>, %arg10: memref<1x1x8xf32, #tpu.memory_space<vmem>>, %arg11: memref<1x8x32xf32, #tpu.memory_space<vmem>>, %arg12: memref<1x32xf32, #tpu.memory_space<vmem>>, %arg13: memref<1x8x32xf32, #tpu.memory_space<vmem>>, %arg14: memref<1x1x8x8xf32, #tpu.memory_space<vmem>>) attributes {dimension_semantics = [#tpu.dimension_semantics<parallel>, #tpu.dimension_semantics<arbitrary>], iteration_bounds = array<i64: 2, 4>, scalar_prefetch = 0 : i64, scratch_operands = 0 : i64, tpu.core_type = #tpu.core_type<tc>, window_params = [{transform_indices = @transform_0, window_bounds = array<i64: 1, 8, 32>}, {transform_indices = @transform_1, window_bounds = array<i64: 1, 8, 32>}, {transform_indices = @transform_2, window_bounds = array<i64: 1, 8, 32>}, {transform_indices = @transform_3, window_bounds = array<i64: 1, 32, 8>}, {transform_indices = @transform_4, window_bounds = array<i64: 1, 1, 8>}, {transform_indices = @transform_5, window_bounds = array<i64: 1, 32, 8>}, {transform_indices = @transform_6, window_bounds = array<i64: 1, 1, 8>}, {transform_indices = @transform_7, window_bounds = array<i64: 1, 32, 8>}, {transform_indices = @transform_8, window_bounds = array<i64: 1, 1, 8>}, {transform_indices = @transform_9, window_bounds = array<i64: 1, 8, 32>}, {pipeline_mode = #tpu.pipeline_mode<synchronous>, transform_indices = @transform_10, window_bounds = array<i64: 1, 32>}, {transform_indices = @transform_11, window_bounds = array<i64: 1, 8, 32>}, {transform_indices = @transform_12, window_bounds = array<i64: 1, 1, 8, 8>}]} {
    %c0 = arith.constant 0 : index
    %c0_0 = arith.constant 0 : index
    %c0_1 = arith.constant 0 : index
    %0 = vector.load %arg2[%c0, %c0_0, %c0_1] : memref<1x8x32xf32, #tpu.memory_space<vmem>>, vector<1x8x32xf32>
    %1 = vector.shape_cast %0 : vector<1x8x32xf32> to vector<8x32xf32>
    %c0_2 = arith.constant 0 : index
    %c0_3 = arith.constant 0 : index
    %c0_4 = arith.constant 0 : index
    %2 = vector.load %arg3[%c0_2, %c0_3, %c0_4] : memref<1x8x32xf32, #tpu.memory_space<vmem>>, vector<1x8x32xf32>
    %3 = vector.shape_cast %2 : vector<1x8x32xf32> to vector<8x32xf32>
    %c0_5 = arith.constant 0 : index
    %c0_6 = arith.constant 0 : index
    %c0_7 = arith.constant 0 : index
    %4 = vector.load %arg4[%c0_5, %c0_6, %c0_7] : memref<1x8x32xf32, #tpu.memory_space<vmem>>, vector<1x8x32xf32>
    %5 = vector.shape_cast %4 : vector<1x8x32xf32> to vector<8x32xf32>
    %c0_8 = arith.constant 0 : index
    %c0_9 = arith.constant 0 : index
    %c0_10 = arith.constant 0 : index
    %6 = vector.load %arg5[%c0_8, %c0_9, %c0_10] : memref<1x32x8xf32, #tpu.memory_space<vmem>>, vector<1x32x8xf32>
    %7 = vector.shape_cast %6 : vector<1x32x8xf32> to vector<32x8xf32>
    %cst = arith.constant dense<0.000000e+00> : vector<8x8xf32>
    %8 = tpu.matmul %1, %7, %cst {dimension_numbers = #tpu.dot_dimension_numbers<[1], [0], [0], [1], [0, 0, 1, 1], [], []>} : vector<8x32xf32>, vector<32x8xf32>, vector<8x8xf32> -> vector<8x8xf32>
    %c0_11 = arith.constant 0 : index
    %c0_12 = arith.constant 0 : index
    %c0_13 = arith.constant 0 : index
    %9 = vector.load %arg6[%c0_11, %c0_12, %c0_13] : memref<1x1x8xf32, #tpu.memory_space<vmem>>, vector<1x1x8xf32>
    %10 = vector.shape_cast %9 : vector<1x1x8xf32> to vector<1x8xf32>
    %11 = vector.broadcast %10 : vector<1x8xf32> to vector<8x8xf32>
    %12 = arith.addf %8, %11 : vector<8x8xf32>
    %c0_14 = arith.constant 0 : index
    %c0_15 = arith.constant 0 : index
    %c0_16 = arith.constant 0 : index
    %13 = vector.load %arg7[%c0_14, %c0_15, %c0_16] : memref<1x32x8xf32, #tpu.memory_space<vmem>>, vector<1x32x8xf32>
    %14 = vector.shape_cast %13 : vector<1x32x8xf32> to vector<32x8xf32>
    %cst_17 = arith.constant dense<0.000000e+00> : vector<8x8xf32>
    %15 = tpu.matmul %3, %14, %cst_17 {dimension_numbers = #tpu.dot_dimension_numbers<[1], [0], [0], [1], [0, 0, 1, 1], [], []>} : vector<8x32xf32>, vector<32x8xf32>, vector<8x8xf32> -> vector<8x8xf32>
    %c0_18 = arith.constant 0 : index
    %c0_19 = arith.constant 0 : index
    %c0_20 = arith.constant 0 : index
    %16 = vector.load %arg8[%c0_18, %c0_19, %c0_20] : memref<1x1x8xf32, #tpu.memory_space<vmem>>, vector<1x1x8xf32>
    %17 = vector.shape_cast %16 : vector<1x1x8xf32> to vector<1x8xf32>
    %18 = vector.broadcast %17 : vector<1x8xf32> to vector<8x8xf32>
    %19 = arith.addf %15, %18 : vector<8x8xf32>
    %c0_21 = arith.constant 0 : index
    %c0_22 = arith.constant 0 : index
    %c0_23 = arith.constant 0 : index
    %20 = vector.load %arg9[%c0_21, %c0_22, %c0_23] : memref<1x32x8xf32, #tpu.memory_space<vmem>>, vector<1x32x8xf32>
    %21 = vector.shape_cast %20 : vector<1x32x8xf32> to vector<32x8xf32>
    %cst_24 = arith.constant dense<0.000000e+00> : vector<8x8xf32>
    %22 = tpu.matmul %5, %21, %cst_24 {dimension_numbers = #tpu.dot_dimension_numbers<[1], [0], [0], [1], [0, 0, 1, 1], [], []>} : vector<8x32xf32>, vector<32x8xf32>, vector<8x8xf32> -> vector<8x8xf32>
    %c0_25 = arith.constant 0 : index
    %c0_26 = arith.constant 0 : index
    %c0_27 = arith.constant 0 : index
    %23 = vector.load %arg10[%c0_25, %c0_26, %c0_27] : memref<1x1x8xf32, #tpu.memory_space<vmem>>, vector<1x1x8xf32>
    %24 = vector.shape_cast %23 : vector<1x1x8xf32> to vector<1x8xf32>
    %25 = vector.broadcast %24 : vector<1x8xf32> to vector<8x8xf32>
    %26 = arith.addf %22, %25 : vector<8x8xf32>
    %cst_28 = arith.constant dense<0.000000e+00> : vector<8x8xf32>
    %27 = tpu.matmul %12, %19, %cst_28 {dimension_numbers = #tpu.dot_dimension_numbers<[1], [1], [0], [0], [0, 0, 1, 0], [], []>} : vector<8x8xf32>, vector<8x8xf32>, vector<8x8xf32> -> vector<8x8xf32>
    %cst_29 = arith.constant 0.353553385 : f32
    %28 = vector.broadcast %cst_29 : f32 to vector<8x8xf32>
    %29 = arith.mulf %27, %28 : vector<8x8xf32>
    %cst_30 = arith.constant dense<0xFF800000> : vector<8xf32>
    %30 = vector.multi_reduction <maximumf>, %29, %cst_30 [1] : vector<8x8xf32> to vector<8xf32>
    %31 = vector.shape_cast %30 : vector<8xf32> to vector<8x1xf32>
    %32 = vector.broadcast %31 : vector<8x1xf32> to vector<8x8xf32>
    %33 = arith.subf %29, %32 : vector<8x8xf32>
    %34 = math.exp %33 : vector<8x8xf32>
    %cst_31 = arith.constant dense<0.000000e+00> : vector<8xf32>
    %35 = vector.multi_reduction <add>, %34, %cst_31 [1] : vector<8x8xf32> to vector<8xf32>
    %36 = vector.shape_cast %35 : vector<8xf32> to vector<8x1xf32>
    %37 = tpu.reciprocal %36 {approx = true} : vector<8x1xf32> -> vector<8x1xf32>
    %38 = vector.broadcast %37 : vector<8x1xf32> to vector<8x8xf32>
    %39 = arith.mulf %34, %38 : vector<8x8xf32>
    %c0_32 = arith.constant 0 : index
    %c0_33 = arith.constant 0 : index
    %c0_34 = arith.constant 0 : index
    %c0_35 = arith.constant 0 : index
    %40 = vector.load %arg14[%c0_32, %c0_33, %c0_34, %c0_35] : memref<1x1x8x8xf32, #tpu.memory_space<vmem>>, vector<1x1x8x8xf32>
    %41 = vector.shape_cast %40 : vector<1x1x8x8xf32> to vector<8x8xf32>
    %42 = vector.shape_cast %39 : vector<8x8xf32> to vector<1x1x8x8xf32>
    tpu.vector_store %arg14[%c0_32, %c0_33, %c0_34, %c0_35], %42 {strides = array<i32>} : memref<1x1x8x8xf32, #tpu.memory_space<vmem>>, vector<1x1x8x8xf32>,
    %cst_36 = arith.constant dense<0.000000e+00> : vector<8x8xf32>
    %43 = tpu.matmul %39, %26, %cst_36 {dimension_numbers = #tpu.dot_dimension_numbers<[1], [0], [0], [1], [0, 0, 1, 1], [], []>} : vector<8x8xf32>, vector<8x8xf32>, vector<8x8xf32> -> vector<8x8xf32>
    %c0_37 = arith.constant 0 : index
    %c0_38 = arith.constant 0 : index
    %c0_39 = arith.constant 0 : index
    %44 = vector.load %arg11[%c0_37, %c0_38, %c0_39] : memref<1x8x32xf32, #tpu.memory_space<vmem>>, vector<1x8x32xf32>
    %45 = vector.shape_cast %44 : vector<1x8x32xf32> to vector<8x32xf32>
    %cst_40 = arith.constant dense<0.000000e+00> : vector<8x32xf32>
    %46 = tpu.matmul %43, %45, %cst_40 {dimension_numbers = #tpu.dot_dimension_numbers<[1], [0], [0], [1], [0, 0, 1, 1], [], []>} : vector<8x8xf32>, vector<8x32xf32>, vector<8x32xf32> -> vector<8x32xf32>
    %c0_i32 = arith.constant 0 : i32
    %47 = arith.cmpi eq, %arg1, %c0_i32 : i32
    %48 = arith.extui %47 : i1 to i32
    %c0_i32_41 = arith.constant 0 : i32
    %49 = arith.cmpi ne, %48, %c0_i32_41 : i32
    scf.if %49 {
      %cst_48 = arith.constant 0.000000e+00 : f32
      %56 = vector.broadcast %cst_48 : f32 to vector<8x32xf32>
      %c0_49 = arith.constant 0 : index
      %c0_50 = arith.constant 0 : index
      %57 = vector.load %arg12[%c0_49, %c0_50] : memref<1x32xf32, #tpu.memory_space<vmem>>, vector<1x32xf32>
      %58 = vector.broadcast %57 : vector<1x32xf32> to vector<8x32xf32>
      %59 = arith.addf %56, %58 : vector<8x32xf32>
      %c0_51 = arith.constant 0 : index
      %c0_52 = arith.constant 0 : index
      %c0_53 = arith.constant 0 : index
      %60 = vector.load %arg13[%c0_51, %c0_52, %c0_53] : memref<1x8x32xf32, #tpu.memory_space<vmem>>, vector<1x8x32xf32>
      %61 = vector.shape_cast %60 : vector<1x8x32xf32> to vector<8x32xf32>
      %62 = vector.shape_cast %59 : vector<8x32xf32> to vector<1x8x32xf32>
      tpu.vector_store %arg13[%c0_51, %c0_52, %c0_53], %62 {strides = array<i32>} : memref<1x8x32xf32, #tpu.memory_space<vmem>>, vector<1x8x32xf32>,
    } else {
    }
    %c0_42 = arith.constant 0 : index
    %c0_43 = arith.constant 0 : index
    %c0_44 = arith.constant 0 : index
    %50 = vector.load %arg13[%c0_42, %c0_43, %c0_44] : memref<1x8x32xf32, #tpu.memory_space<vmem>>, vector<1x8x32xf32>
    %51 = vector.shape_cast %50 : vector<1x8x32xf32> to vector<8x32xf32>
    %52 = arith.addf %51, %46 : vector<8x32xf32>
    %c0_45 = arith.constant 0 : index
    %c0_46 = arith.constant 0 : index
    %c0_47 = arith.constant 0 : index
    %53 = vector.load %arg13[%c0_45, %c0_46, %c0_47] : memref<1x8x32xf32, #tpu.memory_space<vmem>>, vector<1x8x32xf32>
    %54 = vector.shape_cast %53 : vector<1x8x32xf32> to vector<8x32xf32>
    %55 = vector.shape_cast %52 : vector<8x32xf32> to vector<1x8x32xf32>
    tpu.vector_store %arg13[%c0_45, %c0_46, %c0_47], %55 {strides = array<i32>} : memref<1x8x32xf32, #tpu.memory_space<vmem>>, vector<1x8x32xf32>,
    return
  }
  func.func @transform_0(%arg0: i32, %arg1: i32) -> (i32, i32, i32) {
    %c0_i32 = arith.constant 0 : i32
    %c0_i32_0 = arith.constant 0 : i32
    %c0_i32_1 = arith.constant 0 : i32
    return %arg0, %c0_i32, %c0_i32_0 : i32, i32, i32
  }
  func.func @transform_1(%arg0: i32, %arg1: i32) -> (i32, i32, i32) {
    %c0_i32 = arith.constant 0 : i32
    %c0_i32_0 = arith.constant 0 : i32
    %c0_i32_1 = arith.constant 0 : i32
    return %arg0, %c0_i32, %c0_i32_0 : i32, i32, i32
  }
  func.func @transform_2(%arg0: i32, %arg1: i32) -> (i32, i32, i32) {
    %c0_i32 = arith.constant 0 : i32
    %c0_i32_0 = arith.constant 0 : i32
    %c0_i32_1 = arith.constant 0 : i32
    return %arg0, %c0_i32, %c0_i32_0 : i32, i32, i32
  }
  func.func @transform_3(%arg0: i32, %arg1: i32) -> (i32, i32, i32) {
    %c0_i32 = arith.constant 0 : i32
    %c0_i32_0 = arith.constant 0 : i32
    %c0_i32_1 = arith.constant 0 : i32
    return %arg1, %c0_i32, %c0_i32_0 : i32, i32, i32
  }
  func.func @transform_4(%arg0: i32, %arg1: i32) -> (i32, i32, i32) {
    %c0_i32 = arith.constant 0 : i32
    %c0_i32_0 = arith.constant 0 : i32
    %c0_i32_1 = arith.constant 0 : i32
    return %arg1, %c0_i32, %c0_i32_0 : i32, i32, i32
  }
  func.func @transform_5(%arg0: i32, %arg1: i32) -> (i32, i32, i32) {
    %c0_i32 = arith.constant 0 : i32
    %c0_i32_0 = arith.constant 0 : i32
    %c0_i32_1 = arith.constant 0 : i32
    return %arg1, %c0_i32, %c0_i32_0 : i32, i32, i32
  }
  func.func @transform_6(%arg0: i32, %arg1: i32) -> (i32, i32, i32) {
    %c0_i32 = arith.constant 0 : i32
    %c0_i32_0 = arith.constant 0 : i32
    %c0_i32_1 = arith.constant 0 : i32
    return %arg1, %c0_i32, %c0_i32_0 : i32, i32, i32
  }
  func.func @transform_7(%arg0: i32, %arg1: i32) -> (i32, i32, i32) {
    %c0_i32 = arith.constant 0 : i32
    %c0_i32_0 = arith.constant 0 : i32
    %c0_i32_1 = arith.constant 0 : i32
    return %arg1, %c0_i32, %c0_i32_0 : i32, i32, i32
  }
  func.func @transform_8(%arg0: i32, %arg1: i32) -> (i32, i32, i32) {
    %c0_i32 = arith.constant 0 : i32
    %c0_i32_0 = arith.constant 0 : i32
    %c0_i32_1 = arith.constant 0 : i32
    return %arg1, %c0_i32, %c0_i32_0 : i32, i32, i32
  }
  func.func @transform_9(%arg0: i32, %arg1: i32) -> (i32, i32, i32) {
    %c0_i32 = arith.constant 0 : i32
    %c0_i32_0 = arith.constant 0 : i32
    %c0_i32_1 = arith.constant 0 : i32
    return %arg1, %c0_i32, %c0_i32_0 : i32, i32, i32
  }
  func.func @transform_10(%arg0: i32, %arg1: i32) -> (i32, i32) {
    %c0_i32 = arith.constant 0 : i32
    %c0_i32_0 = arith.constant 0 : i32
    %c0_i32_1 = arith.constant 0 : i32
    return %c0_i32, %c0_i32_0 : i32, i32
  }
  func.func @transform_11(%arg0: i32, %arg1: i32) -> (i32, i32, i32) {
    %c0_i32 = arith.constant 0 : i32
    %c0_i32_0 = arith.constant 0 : i32
    %c0_i32_1 = arith.constant 0 : i32
    return %arg0, %c0_i32, %c0_i32_0 : i32, i32, i32
  }
  func.func @transform_12(%arg0: i32, %arg1: i32) -> (i32, i32, i32, i32) {
    %c0_i32 = arith.constant 0 : i32
    %c0_i32_0 = arith.constant 0 : i32
    %c0_i32_1 = arith.constant 0 : i32
    return %arg0, %arg1, %c0_i32, %c0_i32_0 : i32, i32, i32, i32
  }
}

</mosaic_0001>

<bundles_post_ra>
// kernel: tpu_custom_call.1
= control target key start
LH: loop header
LB: loop body
LE: loop exit
PB: predicated region body
PF: predicated region fallthrough
CT: control target
= control target key end

     0   :  { %s1659_s0 = inlined_call_operand.vmem [shape: f32[2,8,32], index: 0, kind: input, shape index: {}]   ;;  %s1660_s1 = inlined_call_operand.vmem [shape: f32[2,8,32], index: 1, kind: input, shape index: {}]   ;;  %s1661_s2 = inlined_call_operand.vmem [shape: f32[2,8,32], index: 2, kind: input, shape index: {}]   ;;  %s1662_s3 = inlined_call_operand.vmem [shape: f32[4,32,8], index: 3, kind: input, shape index: {}]   ;;  %s1663_s4 = inlined_call_operand.vmem [shape: f32[4,1,8], index: 4, kind: input, shape index: {}]   ;;  %s1664_s5 = inlined_call_operand.vmem [shape: f32[4,32,8], index: 5, kind: input, shape index: {}]   ;;  %s1665_s6 = inlined_call_operand.vmem [shape: f32[4,1,8], index: 6, kind: input, shape index: {}]   ;;  %s1666_s7 = inlined_call_operand.vmem [shape: f32[4,32,8], index: 7, kind: input, shape index: {}]   ;;  %s1667_s8 = inlined_call_operand.vmem [shape: f32[4,1,8], index: 8, kind: input, shape index: {}]   ;;  %s1668_s9 = inlined_call_operand.vmem [shape: f32[4,8,32], index: 9, kind: input, shape index: {}]   ;;  %s1669_s10 = inlined_call_operand.vmem [shape: f32[1,32], index: 10, kind: input, shape index: {}]   ;;  %s1670_s11 = inlined_call_operand.hbm [shape: f32[2,8,32], index: 11, kind: output, shape index: {0}]   ;;  %s1671_s12 = inlined_call_operand.hbm [shape: f32[2,4,8,8], index: 12, kind: output, shape index: {1}]  }
   0x1   :  { %1686 = sst [smem:[#allocation18_spill]] %s1659_s0 }
   0x2   :  { %1687 = sst [smem:[#allocation19_spill]] %s1660_s1 }
   0x3   :  { %1688 = sst [smem:[#allocation20_spill]] %s1661_s2 }
   0x4   :  { %1689 = sst [smem:[#allocation21_spill]] %s1662_s3 }
   0x5   :  { %1690 = sst [smem:[#allocation22_spill]] %s1664_s5 }
   0x6   :  { %1691 = sst [smem:[#allocation23_spill]] %s1665_s6 }
   0x7   :  { %1692 = sst [smem:[#allocation24_spill]] %s1668_s9 }
   0x8   :  { %1693 = sst [smem:[#allocation25_spill]] %s1669_s10 }
   0x9   :  { %1694 = sst [smem:[#allocation26_spill]] %s1670_s11 }
   0xa   :  { %1695 = sst [smem:[#allocation27_spill]] %s1671_s12 }
   0xb   :  { %18 = vsyncpa [#allocation3], 0 }
   0xc   :  { %20 = vsyncpa [#allocation3 + $0x1], 0 }
   0xd   :  { %21 = vsyncpa [#allocation5], 0 }
   0xe   :  { %23 = vsyncpa [#allocation5 + $0x1], 0  ;;  %s1385_s21 = smov 0   ;;  %s1387_s22 = smov 0  }
   0xf   :  { %s1389_s23 = smov 0   ;;  %s1391_s24 = smov 0  }
  0x10   :  { %s1393_s25 = smov 0   ;;  %s1395_s26 = smov 0  }
  0x11   :  { %s1397_s27 = smov 0   ;;  %s1399_s28 = smov 0  }
  0x12   :  { %s1401_s29 = smov 0   ;;  %s1403_s30 = smov 0  }
  0x13   :  { %s1405_s13 = smov 0  }
  0x14 LB: > { %1696 = sst [smem:[#allocation8_spill]] %s1286_s23  ;;  %s1025_s14 = sadd.s32 4294967295, %s1318_s13   ;;  %s1318_s13 = sphi %s1405_s13, %s29_s13   ;;  %s1314_s30 = sphi %s1403_s30, %s1735_s30   ;;  %s1310_s29 = sphi %s1401_s29, %s1734_s29   ;;  %s1306_s28 = sphi %s1399_s28, %s1733_s28   ;;  %s1302_s27 = sphi %s1397_s27, %s1732_s27   ;;  %s1298_s26 = sphi %s1395_s26, %s1731_s26   ;;  %s1294_s25 = sphi %s1393_s25, %s1739_s25   ;;  %s1290_s24 = sphi %s1391_s24, %s1738_s24   ;;  %s1286_s23 = sphi %s1389_s23, %s1729_s23   ;;  %s1282_s22 = sphi %s1387_s22, %s1737_s22   ;;  %s1278_s21 = sphi %s1385_s21, %s1736_s21  }
  0x15   : > { %1697 = sst [smem:[#allocation9_spill]] %s1290_s24  ;;  %s1026_s15 = sadd.s32 4294967294, %s1318_s13  }
  0x16   : > { %1698 = sst [smem:[#allocation10_spill]] %s1298_s26  ;;  %s38_s16 = sadd.s32 1, %s1310_s29 }
  0x17   : > { %1699 = sst [smem:[#allocation11_spill]] %s1310_s29  ;;  %s41_s17 = sadd.s32 1, %s1314_s30 }
  0x18   : > { %1700 = sst [smem:[#allocation12_spill]] %s1314_s30  ;;  %p39_p0 = scmp.ge.s32.totalorder %s38_s16, 4 }
  0x19   : > { %s329_s18 = sadd.s32 1, %s1298_s26  ;;  %p339_p1 = scmp.ne.s32.totalorder %s1298_s26, %s1294_s25 }
  0x1a   : > { %p1447_p2 = scmp.eq.s32.totalorder %s1025_s14, 7  ;;  %s1741_s16 = smov (%p39_p0, %s38_s16), 0 }
  0x1b   : > { %1702 = sst [smem:[#allocation13_spill]] %s1741_s16  ;;  %s1743_s17 = smov (!%p39_p0, %s41_s17), %s1314_s30 }
  0x1c   : > { %p1456_p3 = por %p1447_p2, %p339_p1  ;;  %p345_p4 = scmp.ne.s32.totalorder %s1294_s25, %s1290_s24 }
  0x1d   : > { %p43_p5 = scmp.ge.s32.totalorder %s1743_s17, 2  ;;  %p1462_p6 = scmp.eq.s32.totalorder %s1026_s15, 7 }
  0x1e   : > { %s1703_s20 = scalar_select %p1456_p3, 1, 0 }
  0x1f   : > { %s353_s12 = ssub.s32 %s1310_s29, %s1741_s16  ;;  %s357_s11 = sadd.s32 1, %s1286_s23 }
  0x20   : > { %1704 = sst [smem:[#allocation14_spill]] %s1703_s20  ;;  %s1745_s17 = smov (%p43_p5, %s1743_s17), 0 }
  0x21   : > { %1706 = sst [smem:[#allocation15_spill]] %s1745_s17  ;;  %p1473_p7 = por %p1462_p6, %p345_p4 }
  0x22   : > { %p367_p8 = scmp.ne.s32.totalorder %s1286_s23, %s1282_s22  ;;  %s326_s24 = ssub.s32 %s1314_s30, %s1745_s17 }
  0x23   : > { %p373_p9 = scmp.ne.s32.totalorder %s1282_s22, %s1278_s21  ;;  %p327_p10 = scmp.eq.s32.totalorder %s326_s24, 0 }
  0x24   : > { %s354_s15 = sor.u32 %s353_s12, %s326_s24  ;;  %p1485_p12 = por %p367_p8, %p1447_p2 }
  0x25   : > { %p355_p11 = scmp.eq.s32.totalorder %s354_s15, 0  ;;  %p1497_p13 = por %p373_p9, %p1462_p6 }
  0x26   : > { %s1490_s16 = scalar_select %p327_p10, %s1298_s26, %s329_s18  }
  0x27   : > { %s1493_s29 = scalar_select %p355_p11, %s1286_s23, %s357_s11  }
  0x28   : > { %1709 = sst [smem:[#allocation16_spill]] %s1490_s16  ;;  %p1029_p0 = scmp.ge.s32.totalorder %s1318_s13, 1 }
  0x29   : > { %1710 = sst [smem:[#allocation17_spill]] %s1493_s29  ;;  %p465_p1 = scmp.lt.s32.totalorder %s1318_s13, 9 }
  0x2b   : > { %p466_p4 = pnand %p1029_p0, %p465_p1 }
  0x2c   : > { %p559_p2 = scmp.lt.s32.totalorder (!%p466_p4), %s1302_s27, 3  ;;  %s1682_s12 = sand.u32 (!%p466_p4), 1, %s1294_s25  }
  0x2d   : > { %469 = sbr.rel (%p466_p4) target bundleno = 883 (0x373), region = 64  ;;  %s1507_s11 = sshll.u32 (!%p466_p4), %s1682_s12, 3 }
  0x2e   : > { %p547_p5 = scmp.lt.s32.totalorder (!%p466_p4), %s1306_s28, 1  ;;  %s1712_s6 = sld [smem:[#allocation23_spill]] (!%p466_p4) }
  0x2f   : > { %s1713_s5 = sld [smem:[#allocation22_spill]] (!%p466_p4)  ;;  %p1049_p6 = scmp.ne.s32.totalorder (!%p466_p4), %s1302_s27, 0 }
  0x30   : > { %s1714_s3 = sld [smem:[#allocation21_spill]] (!%p466_p4) }
  0x31   : > { %s1715_s1 = sld [smem:[#allocation19_spill]] (!%p466_p4) }
  0x32   : > { %s1511_s24 = scalar_select %p559_p2, %s1302_s27, 3  ;;  %vm598_vm0 = vcmask 261120   ;;  %vm684_vm1 = vcmask 64512  }
  0x33   : > { %s548_s23 = scalar_select %p547_p5, %s1306_s28, 1 }
  0x34   : > { %s1514_s18 = sshll.u32 %s1511_s24, 5  ;;  %s574_s15 = scalar_lea.vmem %s1712_s6, %s1511_s24 }
  0x35   : > { %s571_s16 = scalar_lea.vmem %s1713_s5, %s1514_s18  ;;  %s1529_s19 = sshll.u32 %s548_s23, 3  ;;  %v1160_v10 = vld [vmem:[%s574_s15] ss:$0 sm:$0xff] }
  0x36   : > { %s563_s29 = scalar_lea.vmem %s1714_s3, %s1514_s18  ;;  %v625_v0 = vld [vmem:[%s571_s16 + $0x18] sm:$0xff]  ;;  %v624_v1 = vld [vmem:[%s571_s16 + $0x10] sm:$0xff]  ;;  %v623_v4 = vld [vmem:[%s571_s16 + $0x8] sm:$0xff]  ;;  %s1716_s0 = sld [smem:[#allocation18_spill]] }
  0x37   : > { %v593_v2 = vld [vmem:[%s563_s29 + $0x18] sm:$0xff]  ;;  %645 = vmatpush.msra.mxu1 %v625_v0  ;;  %v592_v3 = vld [vmem:[%s563_s29 + $0x10] sm:$0xff]  ;;  %v591_v5 = vld [vmem:[%s563_s29 + $0x8] sm:$0xff]  ;;  %s554_s26 = scalar_lea.vmem %s1715_s1, %s1529_s19  ;;  %s566_s6 = scalar_lea.vmem %s1663_s4, %s1511_s24 }
  0x38   : > { %614 = vmatpush.msra.mxu0 %v593_v2  ;;  %v622_v6 = vld [vmem:[%s571_s16] sm:$0xff]  ;;  %s1717_s2 = sld [smem:[#allocation20_spill]]  ;;  %s582_s17 = scalar_lea.vmem %s1667_s8, %s1511_s24 }
  0x39   : > { %646 = vmatpush.msra.mxu1 %v624_v1  ;;  %v590_v7 = vld [vmem:[%s563_s29] sm:$0xff]  ;;  %s579_s29 = scalar_lea.vmem %s1666_s7, %s1514_s18  ;;  %s1718_s14 = sld [smem:[#allocation24_spill]] }
  0x3a   : > { %615 = vmatpush.msra.mxu0 %v592_v3  ;;  %v588_v8 = vld [vmem:[%s554_s26] sm:$0xff]  ;;  %v656_v16 = vld [vmem:[%s579_s29 + $0x18] sm:$0xff]  ;;  %v655_v17 = vld [vmem:[%s579_s29 + $0x10] sm:$0xff] }
  0x3b   : > { %647 = vmatpush.msra.mxu1 %v623_v4  ;;  %v1161_v11 = vld [vmem:[%s566_s6] ss:$0 sm:$0xff]  ;;  %676 = vmatpush.msra.mxu2 %v656_v16  ;;  %v654_v18 = vld [vmem:[%s579_s29 + $0x8] sm:$0xff] }
  0x3c   : > { %s550_s3 = scalar_lea.vmem %s1716_s0, %s1529_s19  ;;  %616 = vmatpush.msra.mxu0 %v591_v5  ;;  %v653_v19 = vld [vmem:[%s579_s29] sm:$0xff] }
  0x3d   : > { %v587_v9 = vld [vmem:[%s550_s3] sm:$0xff]  ;;  %648 = vmatpush.msra.mxu1 %v622_v6  ;;  %677 = vmatpush.msra.mxu2 %v655_v17  ;;  %s1684_s3 = sand.u32 1, %s1282_s22  }
  0x3e   : > { %617 = vmatpush.msra.mxu0 %v590_v7  ;;  %1043 = vmatmul.msk.f32.vlgmr.msra.gmra.mxu1 %vm598_vm0, %v588_v8  ;;  %s558_s15 = scalar_lea.vmem %s1717_s2, %s1529_s19  ;;  %v1162_v24 = vld [vmem:[%s582_s17] ss:$0 sm:$0xff]  ;;  %s1041_s19 = sshll.u32 %s1511_s24, 3 }
  0x3f   : > { %1042 = vmatmul.msk.f32.vlgmr.msra.gmra.mxu0 %vm598_vm0, %v587_v9  ;;  %678 = vmatpush.msra.mxu2 %v654_v18  ;;  %v589_v20 = vld [vmem:[%s558_s15] sm:$0xff]  ;;  %s586_s23 = scalar_lea.vmem %s1718_s14, %s1041_s19  ;;  %s1569_s5 = sshll.u32 %s1684_s3, 3 }
  0x40   : > { %v747_v32 = vld [vmem:[%s586_s23] sm:$0xff]  ;;  %s1685_s29 = scalar_lea.vmem [#allocation4], %s1569_s5  ;;  %s539_s24 = scalar_lea.vmem [#allocation2], %s1507_s11 }
  0x41   : > { %679 = vmatpush.msra.mxu2 %v653_v19  ;;  %766 = vmatpush.msrb.mxu0 %v747_v32  ;;  %s1719_s15 = sld [smem:[#allocation25_spill]] (!%p1049_p6) }
  0x42   : > { %1044 = vmatmul.msk.f32.vlgmr.msra.gmra.mxu2 %vm598_vm0, %v589_v20 }
  0xbb   : > { %v650_v12 = vpop.f32.mrf.mxu1 }
  0xbc   : > { %v619_v13 = vpop.f32.mrf.mxu0  ;;  %v651_v14 = vadd.f32 %v1160_v10, %v650_v12 }
  0xbd   : > { %v620_v15 = vadd.f32 %v1161_v11, %v619_v13 }
  0xbe   : > { %1045 = vmatpush.xpose.msk.msra.mxu3 %vm684_vm1, %v651_v14 }
  0xc1   : > { %1046 = vmatmul.msk.f32.vlgmr.msra.gmra.mxu3 %vm684_vm1, %v620_v15 }
  0xc5   : > { %v681_v25 = vpop.f32.mrf.mxu2 }
  0xc6   : > { %v682_v26 = vadd.f32 %v1162_v24, %v681_v25 }
  0xc8   : > { %742 = vmatpush.msrb.mxu3 %v682_v26 }
 0x144   : > { %v708_v21 = vpop.f32.mrf.mxu3 }
 0x145   : > { %v711_v22 = vmul.f32 0.35355338, %v708_v21 }
 0x147   : > { %v712_v23 = vsel %vm684_vm1, %v711_v22, -inf }
 0x148   : > { %713 = vmax.xlane.f32.xlu0 %v712_v23 }
 0x1bb   : > { %v714_v27 = vpop.xlane.xlu0 %713 }
 0x1bc   : > { %v715_v28 = vsub.f32 %v711_v22, %v714_v27 }
 0x1be   : > { %v716_v29 = vmul.f32 1.442695, %v715_v28 }
 0x1c0   : > { %1163 = vpow2.f32 %v716_v29 }
 0x1c6   : > { %v1164_v30 = vpop.eup %1163 }
 0x1c7   : > { %v718_v31 = vsel %vm684_vm1, %v1164_v30, 0.0 }
 0x1c8   : > { %719 = vadd.xlane.f32.xlu0 %v718_v31 }
 0x23b   : > { %v720_v33 = vpop.xlane.xlu0 %719 }
 0x23c   : > { %1165 = vrcp.f32 %v720_v33 }
 0x242   : > { %v1166_v34 = vpop.eup %1165 }
 0x243   : > { %v722_v35 = vmul.f32 %v1166_v34, %v1164_v30 }
 0x245   : > { %723 = vst.msk [vmem:[%s1685_s29] sm:$0xff] %vm684_vm1, %v722_v35  ;;  %1047 = vmatmul.msk.f32.vlgmr.msrb.gmra.mxu3 %vm684_vm1, %v722_v35 }
 0x2c8   : > { %v744_v36 = vpop.f32.mrf.mxu3 }
 0x2c9   : > { %1048 = vmatmul.msk.f32.vlgmr.msrb.gmra.mxu0 %vm684_vm1, %v744_v36 }
 0x342   : > { %774 = sbr.rel (%p1049_p6) target bundleno = 841 (0x349), region = 68 }
 0x346   : > { %v768_v37 = vpop.f32.mrf.mxu0 }
 0x347   : > { %v1167_v38 = vld [vmem:[%s1719_s15] ss:$0 sm:$0xff] }
 0x348   : > { %780 = vst.msk [vmem:[%s539_s24] sm:$0xff] %vm598_vm0, %v1167_v38 }
 0x349 PF: > { %s1052_s30 = sshll.u32 %s1306_s28, 3  ;;  %s1721_s26 = sld [smem:[#allocation26_spill]] }
 0x34a   : > { %s802_s14 = sshll.u32 %s539_s24, 4  ;;  %s1723_s16 = sand.u32 1, %s1294_s25   ;;  %s803_s14 = int_to_ptr.vmem [resolvable:$true] %s802_s14 }
 0x34b   : > { %s785_s6 = scalar_lea.sflag [#allocation3], %s1723_s16 }
 0x34f   : > { %v781_v39 = vld [vmem:[%s539_s24] sm:$0xff]  ;;  %s1722_s12 = smov %s1721_s26  ;;  %s800_s11 = scalar_lea.hbm %s1721_s26, %s1052_s30 }
 0x350   : > { %v782_v40 = vadd.f32 %v781_v39, %v768_v37  ;;  %s804_s23 = sshll.u32 %s800_s11, 4  ;;  %s1188_s17 = scalar_lea.hbm %s1722_s12, 16  ;;  %s805_s23 = int_to_ptr.hbm [resolvable:$true] %s804_s23 }
 0x351   : > { %s1182_s15 = sshra.s32 %s805_s23, 4  ;;  %s1183_s15 = int_to_ptr.hbm [resolvable:$true] %s1182_s15 }
 0x352   : > { %783 = vst.msk [vmem:[%s539_s24] sm:$0xff] %vm598_vm0, %v782_v40  ;;  %s1184_s3 = scalar_lea.hbm %s1183_s15, 8  ;;  %p1189_p11 = scmp.lt.s32.totalorder %s1183_s15, %s1722_s12 }
 0x353   : > { %p1185_p8 = scmp.ne.s32.totalorder %s1183_s15, %s1184_s3  ;;  %p1190_p0 = scmp.lt.s32.totalorder %s1188_s17, %s1184_s3 }
 0x355   : > { %p1186_p9 = pnand %p1185_p8, %p1456_p3  ;;  %p1191_p1 = por %p1190_p0, %p1189_p11 }
 0x357   : > { %p1187_p10 = pneg %p1186_p9 }
 0x359   : > { %p1192_p4 = pnand %p1191_p1, %p1187_p10 }
 0x35b   : > { %1195 = shalt.err (!%p1192_p4)
}
 0x35c   : > { %1060 = dma.vmem_to_hbm [thread:$0]  (%p1456_p3), %s803_s14, 128, %s805_s23, %s785_s6  }
 0x35d   : > { %s1053_s24 = sshll.u32 %s1306_s28, 2  ;;  %s1724_s26 = scalar_lea.vmem [#allocation4], %s1569_s5 }
 0x35e   : > { %s818_s0 = sshll.u32 %s1724_s26, 4  ;;  %s814_s29 = sadd.s32 %s1302_s27, %s1053_s24  ;;  %s819_s0 = int_to_ptr.vmem [resolvable:$true] %s818_s0 }
 0x35f   : > { %s1054_s11 = sshll.u32 %s814_s29, 3  ;;  %s1725_s15 = sld [smem:[#allocation27_spill]] }
 0x360   : > { %s1726_s19 = sand.u32 1, %s1282_s22  }
 0x361   : > { %s790_s18 = scalar_lea.sflag [#allocation5], %s1726_s19 }
 0x365   : > { %s816_s3 = scalar_lea.hbm %s1725_s15, %s1054_s11  ;;  %s1216_s27 = scalar_lea.hbm %s1725_s15, 64 }
 0x366   : > { %s820_s17 = sshll.u32 %s816_s3, 4  ;;  %s821_s17 = int_to_ptr.hbm [resolvable:$true] %s820_s17 }
 0x367   : > { %s1210_s1 = sshra.s32 %s821_s17, 4  ;;  %s1211_s1 = int_to_ptr.hbm [resolvable:$true] %s1210_s1 }
 0x368   : > { %s1212_s2 = scalar_lea.hbm %s1211_s1, 8  ;;  %p1217_p6 = scmp.lt.s32.totalorder %s1211_s1, %s1725_s15 }
 0x369   : > { %p1213_p2 = scmp.ne.s32.totalorder %s1211_s1, %s1212_s2  ;;  %p1218_p8 = scmp.lt.s32.totalorder %s1216_s27, %s1212_s2 }
 0x36b   : > { %p1214_p3 = pnand %p1213_p2, %p1485_p12  ;;  %p1219_p9 = por %p1218_p8, %p1217_p6 }
 0x36d   : > { %p1215_p5 = pneg %p1214_p3 }
 0x36f   : > { %p1220_p10 = pnand %p1219_p9, %p1215_p5 }
 0x371   : > { %1223 = shalt.err (!%p1220_p10)
}
 0x372   : > { %1061 = dma.vmem_to_hbm [thread:$0]  (%p1485_p12), %s819_s0, 128, %s821_s17, %s790_s18  }
 0x373 PF: > { %s1727_s6 = sld [smem:[#allocation9_spill]]  ;;  %p1071_p11 = scmp.ge.s32.totalorder %s1318_s13, 2 }
 0x375   : > { %p1065_p0 = pnand %p1071_p11, %p1473_p7 }
 0x377   : > { %p1066_p1 = pneg %p1065_p0 }
 0x379   : > { %s832_s24 = sand.u32 1, %s1727_s6  }
 0x37a   : > { %s833_s26 = scalar_lea.sflag [#allocation3], %s832_s24 }
 0x37b   : > { %1269 = dma.done.wait (%p1066_p1), %s833_s26, 128  }
 0x37c   : > { %1271 = vsyncadd (%p1066_p1), %s833_s26, 4294967168  ;;  %s842_s1 = sand.u32 1, %s1278_s21   ;;  %p1068_p4 = pnand %p1071_p11, %p1497_p13 }
 0x37d   : > { %s843_s2 = scalar_lea.sflag [#allocation5], %s842_s1 }
 0x37e   : > { %p1069_p2 = pneg %p1068_p4 }
 0x380   : > { %1273 = dma.done.wait (%p1069_p2), %s843_s2, 128  }
 0x381   : > { %1275 = vsyncadd (%p1069_p2), %s843_s2, 4294967168  ;;  %s29_s13 = sadd.s32 1, %s1318_s13   ;;  %s1728_s20 = sld [smem:[#allocation8_spill]] }
 0x382   : > { %p26_p12 = scmp.ge.s32.totalorder %s29_s13, 10   ;;  %s1729_s23 = sld [smem:[#allocation17_spill]] }
 0x383   : > { %s1730_s10 = sld [smem:[#allocation10_spill]]  ;;  %s1736_s21 = smov %s1282_s22 }
 0x384   : > { %s1731_s26 = sld [smem:[#allocation16_spill]]  ;;  %s1738_s24 = smov %s1294_s25 }
 0x385   : > { %s1732_s27 = sld [smem:[#allocation11_spill]]  ;;  %28 = sbr.rel (!%p26_p12) target bundleno = 20 (0x14), region = 147 }
 0x386   : > { %s1733_s28 = sld [smem:[#allocation12_spill]] }
 0x387   : > { %s1734_s29 = sld [smem:[#allocation13_spill]]  ;;  %s1737_s22 = smov %s1728_s20 }
 0x388   : > { %s1735_s30 = sld [smem:[#allocation15_spill]] }
 0x389   : > { %s1739_s25 = smov %s1730_s10 }
 0x38a   :  { %849 = vsyncpa [#allocation3], 1 }
 0x38b   :  { %851 = vsyncpa [#allocation3 + $0x1], 1 }
 0x38c   :  { %852 = vsyncpa [#allocation5], 1 }
 0x38d   :  { %854 = vsyncpa [#allocation5 + $0x1], 1 }

</bundles_post_ra>
